<compile_context>
chip_gen: v5e
topology: v5e:2x2
jax: 0.10.0
libtpu: 0.0.40
codegen_flags: <defaults>
</compile_context>

<pallas_src>
import jax
import jax.numpy as jnp
from jax.experimental import pallas as pl
from jax.experimental.pallas import tpu as pltpu

EPS = 1e-12
_TILE_R_MAX = 512                       # rows per grid step (cap)
_SUB_R = 256                            # in-kernel sub-chunk rows
_FALLBACK_VMEM_CAP = 64 * 1024 * 1024   # v7x physical VMEM (conservative fallback)


def _round_up(x, m):
    return (x + m - 1) // m * m


def _vmem_cap_bytes():
    # Generation-aware VMEM ceiling: 128 MiB parts (v5e/v6e) should not inherit
    # v7x's 64 MiB. Leave ~15% headroom for Mosaic internal scratch.
    try:
        return int(pltpu.get_tpu_info().vmem_capacity_bytes * 0.85)
    except Exception:
        return _FALLBACK_VMEM_CAP


def _make_kernel(sub_r, n_sub):
    def kernel(x_ref, w_ref, b_ref, res_ref, gamma_ref, beta_ref, o_ref):
        # x_ref:     (tile_r, I)  activations in native dtype (streamed)
        # w_ref:     (I, H)       bf16 dense weight (VMEM-resident, single buffer)
        # b_ref:     (1, H)       f32 dense bias (resident)
        # res_ref:   (tile_r, H)  residual (streamed, native dtype)
        # gamma_ref: (1, H)       f32 LayerNorm weight (resident)
        # beta_ref:  (1, H)       f32 LayerNorm bias (resident)
        # o_ref:     (tile_r, H)  output (streamed, caller dtype)
        w = w_ref[...]
        bias = b_ref[...].astype(jnp.float32)
        gamma = gamma_ref[...].astype(jnp.float32)
        beta = beta_ref[...].astype(jnp.float32)
        inv_h = 1.0 / w.shape[-1]

        # Static sub-chunk split: lets the VLIW scheduler co-issue chunk c's
        # VPU/XLU LayerNorm epilogue with chunk c+1's MXU matmul pushes.
        for c in range(n_sub):
            lo = c * sub_r
            x = x_ref[lo:lo + sub_r, :].astype(jnp.bfloat16)   # in-kernel bf16 cast
            h = jnp.dot(x, w, preferred_element_type=jnp.float32)
            h = h + bias
            # dropout: inference-mode no-op (PyTorch nn.Dropout in eval()).
            h = h + res_ref[lo:lo + sub_r, :].astype(jnp.float32)

            # LayerNorm over last axis — single-pass moments + EUP rsqrt.
            s1 = jnp.sum(h, axis=-1, keepdims=True)
            s2 = jnp.sum(h * h, axis=-1, keepdims=True)
            mean = s1 * inv_h
            var = jnp.maximum(s2 * inv_h - mean * mean, 0.0)
            out = (h - mean) * jax.lax.rsqrt(var + EPS)
            out = out * gamma + beta
            o_ref[lo:lo + sub_r, :] = out.astype(o_ref.dtype)

    return kernel


def bert_output(hidden_states, input_tensor, w, b, gamma, beta, *, tile_r=None):
    """LayerNorm(hidden_states @ w + b + input_tensor), eps=1e-12.

    hidden_states: (B, S, I); input_tensor: (B, S, H); returns (B, S, H) in
    input_tensor.dtype (bf16 callers stream residual/output at 2 B/elem).
    """
    B, S, I = hidden_states.shape
    H = input_tensor.shape[-1]
    R = B * S
    out_dtype = input_tensor.dtype

    # Row tile: multiple of 16 (bf16 sublane packing), capped at 512; for small
    # R split into >= 2 tiles so both v7x TensorCores get a grid step.
    if tile_r is None:
        tile_r = min(_TILE_R_MAX, _round_up(max(pl.cdiv(R, 2), 16), 16))
    tile_r = max(16, _round_up(int(tile_r), 16))
    tile_r = min(tile_r, _round_up(R, 16))
    num_tiles = pl.cdiv(R, tile_r)      # partial last block handled by Pallas masking

    # In-kernel sub-chunking of each tile (epilogue/MXU overlap).
    if tile_r > _SUB_R and tile_r % _SUB_R == 0:
        sub_r = _SUB_R
    else:
        sub_r = tile_r
    n_sub = tile_r // sub_r

    # Token-major 2-D views; NO dtype cast and NO padding copies of activations.
    x2d = hidden_states.reshape(R, I)
    res2d = input_tensor.reshape(R, H)
    w_bf16 = w.astype(jnp.bfloat16)                 # cast once (parameter-sized)
    b2d = b.reshape(1, H).astype(jnp.float32)
    gamma2d = gamma.reshape(1, H).astype(jnp.float32)
    beta2d = beta.reshape(1, H).astype(jnp.float32)

    x_bytes = jnp.dtype(x2d.dtype).itemsize
    res_bytes = jnp.dtype(res2d.dtype).itemsize
    out_bytes = jnp.dtype(out_dtype).itemsize

    cost = pl.CostEstimate(
        flops=2 * R * I * H,
        transcendentals=R,                          # one rsqrt per row
        bytes_accessed=(R * I * x_bytes + I * H * 2
                        + R * H * res_bytes + R * H * out_bytes + 3 * H * 4),
    )

    kernel = _make_kernel(sub_r, n_sub)

    def call(single_buffer_resident):
        def resident(shape):
            if single_buffer_resident:
                return pl.BlockSpec(shape, lambda i: (0,) * len(shape),
                                    pipeline_mode=pl.Buffered(1))
            return pl.BlockSpec(shape, lambda i: (0,) * len(shape))

        w_bufs = 1 if single_buffer_resident else 2
        # VMEM budget: double-buffered streamed tiles + resident weight/params.
        est = (2 * tile_r * I * x_bytes
               + 2 * tile_r * H * res_bytes
               + 2 * tile_r * H * out_bytes
               + w_bufs * I * H * 2
               + w_bufs * 3 * H * 4)
        vmem_limit = int(min(max(2 * est, 32 * 1024 * 1024), _vmem_cap_bytes()))

        return pl.pallas_call(
            kernel,
            out_shape=jax.ShapeDtypeStruct((R, H), out_dtype),
            grid=(num_tiles,),
            in_specs=[
                pl.BlockSpec((tile_r, I), lambda i: (i, 0)),   # x: streamed
                resident((I, H)),                              # W: resident
                resident((1, H)),                              # bias: resident
                pl.BlockSpec((tile_r, H), lambda i: (i, 0)),   # residual: streamed
                resident((1, H)),                              # gamma: resident
                resident((1, H)),                              # beta: resident
            ],
            out_specs=pl.BlockSpec((tile_r, H), lambda i: (i, 0)),
            compiler_params=pltpu.CompilerParams(
                dimension_semantics=("parallel",),   # shard row tiles across TCs
                vmem_limit_bytes=vmem_limit,
            ),
            cost_estimate=cost,
        )(x2d, w_bf16, b2d, res2d, gamma2d, beta2d)

    try:
        out2d = call(True)
    except Exception:
        # Fallback for Pallas builds that reject pipeline_mode=pl.Buffered(1).
        out2d = call(False)

    return out2d.reshape(B, S, H)


# ---------------------------------------------------------------------------
# References
# ---------------------------------------------------------------------------
def _layernorm(h, gamma, beta):
    mean = jnp.mean(h, axis=-1, keepdims=True)
    var = jnp.mean((h - mean) ** 2, axis=-1, keepdims=True)
    return (h - mean) / jnp.sqrt(var + EPS) * gamma + beta


def reference_f32(hidden_states, input_tensor, w, b, gamma, beta):
    h = jnp.einsum("bsi,ih->bsh", hidden_states, w) + b
    return _layernorm(h + input_tensor, gamma, beta)


def reference_bf16_matmul(hidden_states, input_tensor, w, b, gamma, beta):
    h = jnp.einsum("bsi,ih->bsh",
                   hidden_states.astype(jnp.bfloat16),
                   w.astype(jnp.bfloat16),
                   preferred_element_type=jnp.float32) + b
    return _layernorm(h + input_tensor, gamma, beta)


if __name__ == "__main__":
    # Small config consistent with BertOutput (intermediate_size -> hidden_size).
    # S chosen so R = 24 is NOT a multiple of the 16-row tile: exercises both the
    # multi-step streamed grid and the partial-last-block masked store.
    B, S = 2, 12
    INTERMEDIATE, HIDDEN = 64, 32

    key = jax.random.PRNGKey(0)
    k1, k2, k3, k4, k5, k6 = jax.random.split(key, 6)

    hidden_states = jax.random.normal(k1, (B, S, INTERMEDIATE), dtype=jnp.float32)
    input_tensor = jax.random.normal(k2, (B, S, HIDDEN), dtype=jnp.float32)

    # Deterministic synthetic parameters (nn.Linear(I, H) + LayerNorm(H)).
    w = jax.random.normal(k3, (INTERMEDIATE, HIDDEN), dtype=jnp.float32) * 0.02
    b = jax.random.normal(k4, (HIDDEN,), dtype=jnp.float32) * 0.02
    gamma = 1.0 + 0.1 * jax.random.normal(k5, (HIDDEN,), dtype=jnp.float32)
    beta = 0.1 * jax.random.normal(k6, (HIDDEN,), dtype=jnp.float32)

    out = bert_output(hidden_states, input_tensor, w, b, gamma, beta)
    out = jax.block_until_ready(out)
    assert out.shape == (B, S, HIDDEN)

    # Tight check vs a reference with the same bf16-matmul / f32-epilogue numerics.
    ref_bf16 = reference_bf16_matmul(hidden_states, input_tensor, w, b, gamma, beta)
    assert jnp.allclose(out, ref_bf16, atol=1e-4, rtol=1e-4), "mismatch vs bf16-matmul reference"

    # Sanity check vs the pure-f32 PyTorch-equivalent reference (bf16 matmul tolerance).
    ref_f32 = reference_f32(hidden_states, input_tensor, w, b, gamma, beta)
    assert jnp.allclose(out, ref_f32, atol=5e-2, rtol=5e-2), "mismatch vs f32 reference"

    print("KERNEL_OK")
</pallas_src>

<mosaic_0001>
module attributes {stable_mosaic.version = 11 : i64} {
  func.func @kernel(%arg0: i32, %arg1: memref<16x64xf32, #tpu.memory_space<vmem>>, %arg2: memref<64x32xbf16, #tpu.memory_space<vmem>>, %arg3: memref<1x32xf32, #tpu.memory_space<vmem>>, %arg4: memref<16x32xf32, #tpu.memory_space<vmem>>, %arg5: memref<1x32xf32, #tpu.memory_space<vmem>>, %arg6: memref<1x32xf32, #tpu.memory_space<vmem>>, %arg7: memref<16x32xf32, #tpu.memory_space<vmem>>) attributes {dimension_semantics = [#tpu.dimension_semantics<parallel>], iteration_bounds = array<i64: 2>, scalar_prefetch = 0 : i64, scratch_operands = 0 : i64, tpu.core_type = #tpu.core_type<tc>, window_params = [{transform_indices = @transform_0, window_bounds = array<i64: 16, 64>}, {pipeline_mode = #tpu.pipeline_mode<synchronous>, transform_indices = @transform_1, window_bounds = array<i64: 64, 32>}, {pipeline_mode = #tpu.pipeline_mode<synchronous>, transform_indices = @transform_2, window_bounds = array<i64: 1, 32>}, {transform_indices = @transform_3, window_bounds = array<i64: 16, 32>}, {pipeline_mode = #tpu.pipeline_mode<synchronous>, transform_indices = @transform_4, window_bounds = array<i64: 1, 32>}, {pipeline_mode = #tpu.pipeline_mode<synchronous>, transform_indices = @transform_5, window_bounds = array<i64: 1, 32>}, {transform_indices = @transform_6, window_bounds = array<i64: 16, 32>}]} {
    %c0 = arith.constant 0 : index
    %c0_0 = arith.constant 0 : index
    %0 = vector.load %arg2[%c0, %c0_0] : memref<64x32xbf16, #tpu.memory_space<vmem>>, vector<64x32xbf16>
    %c0_1 = arith.constant 0 : index
    %c0_2 = arith.constant 0 : index
    %1 = vector.load %arg3[%c0_1, %c0_2] : memref<1x32xf32, #tpu.memory_space<vmem>>, vector<1x32xf32>
    %c0_3 = arith.constant 0 : index
    %c0_4 = arith.constant 0 : index
    %2 = vector.load %arg5[%c0_3, %c0_4] : memref<1x32xf32, #tpu.memory_space<vmem>>, vector<1x32xf32>
    %c0_5 = arith.constant 0 : index
    %c0_6 = arith.constant 0 : index
    %3 = vector.load %arg6[%c0_5, %c0_6] : memref<1x32xf32, #tpu.memory_space<vmem>>, vector<1x32xf32>
    %c0_7 = arith.constant 0 : index
    %c0_8 = arith.constant 0 : index
    %4 = vector.load %arg1[%c0_7, %c0_8] : memref<16x64xf32, #tpu.memory_space<vmem>>, vector<16x64xf32>
    %5 = arith.truncf %4 : vector<16x64xf32> to vector<16x64xbf16>
    %cst = arith.constant dense<0.000000e+00> : vector<16x32xf32>
    %6 = tpu.matmul %5, %0, %cst {dimension_numbers = #tpu.dot_dimension_numbers<[1], [0], [0], [1], [0, 0, 1, 1], [], []>} : vector<16x64xbf16>, vector<64x32xbf16>, vector<16x32xf32> -> vector<16x32xf32>
    %7 = vector.broadcast %1 : vector<1x32xf32> to vector<16x32xf32>
    %8 = arith.addf %6, %7 : vector<16x32xf32>
    %c0_9 = arith.constant 0 : index
    %c0_10 = arith.constant 0 : index
    %9 = vector.load %arg4[%c0_9, %c0_10] : memref<16x32xf32, #tpu.memory_space<vmem>>, vector<16x32xf32>
    %10 = arith.addf %8, %9 : vector<16x32xf32>
    %cst_11 = arith.constant dense<0.000000e+00> : vector<16xf32>
    %11 = vector.multi_reduction <add>, %10, %cst_11 [1] : vector<16x32xf32> to vector<16xf32>
    %12 = vector.shape_cast %11 : vector<16xf32> to vector<16x1xf32>
    %13 = arith.mulf %10, %10 : vector<16x32xf32>
    %cst_12 = arith.constant dense<0.000000e+00> : vector<16xf32>
    %14 = vector.multi_reduction <add>, %13, %cst_12 [1] : vector<16x32xf32> to vector<16xf32>
    %15 = vector.shape_cast %14 : vector<16xf32> to vector<16x1xf32>
    %cst_13 = arith.constant 3.125000e-02 : f32
    %16 = vector.broadcast %cst_13 : f32 to vector<16x1xf32>
    %17 = arith.mulf %12, %16 : vector<16x1xf32>
    %cst_14 = arith.constant 3.125000e-02 : f32
    %18 = vector.broadcast %cst_14 : f32 to vector<16x1xf32>
    %19 = arith.mulf %15, %18 : vector<16x1xf32>
    %20 = arith.mulf %17, %17 : vector<16x1xf32>
    %21 = arith.subf %19, %20 : vector<16x1xf32>
    %cst_15 = arith.constant 0.000000e+00 : f32
    %22 = vector.broadcast %cst_15 : f32 to vector<16x1xf32>
    %23 = arith.maximumf %21, %22 : vector<16x1xf32>
    %24 = vector.broadcast %17 : vector<16x1xf32> to vector<16x32xf32>
    %25 = arith.subf %10, %24 : vector<16x32xf32>
    %cst_16 = arith.constant 9.99999996E-13 : f32
    %26 = vector.broadcast %cst_16 : f32 to vector<16x1xf32>
    %27 = arith.addf %23, %26 : vector<16x1xf32>
    %28 = math.rsqrt %27 : vector<16x1xf32>
    %29 = vector.broadcast %28 : vector<16x1xf32> to vector<16x32xf32>
    %30 = arith.mulf %25, %29 : vector<16x32xf32>
    %31 = vector.broadcast %2 : vector<1x32xf32> to vector<16x32xf32>
    %32 = arith.mulf %30, %31 : vector<16x32xf32>
    %33 = vector.broadcast %3 : vector<1x32xf32> to vector<16x32xf32>
    %34 = arith.addf %32, %33 : vector<16x32xf32>
    %c0_17 = arith.constant 0 : index
    %c0_18 = arith.constant 0 : index
    %35 = vector.load %arg7[%c0_17, %c0_18] : memref<16x32xf32, #tpu.memory_space<vmem>>, vector<16x32xf32>
    tpu.vector_store %arg7[%c0_17, %c0_18], %34 {strides = array<i32>} : memref<16x32xf32, #tpu.memory_space<vmem>>, vector<16x32xf32>,
    return
  }
  func.func @transform_0(%arg0: i32) -> (i32, i32) {
    %c0_i32 = arith.constant 0 : i32
    %c0_i32_0 = arith.constant 0 : i32
    return %arg0, %c0_i32 : i32, i32
  }
  func.func @transform_1(%arg0: i32) -> (i32, i32) {
    %c0_i32 = arith.constant 0 : i32
    %c0_i32_0 = arith.constant 0 : i32
    %c0_i32_1 = arith.constant 0 : i32
    return %c0_i32, %c0_i32_0 : i32, i32
  }
  func.func @transform_2(%arg0: i32) -> (i32, i32) {
    %c0_i32 = arith.constant 0 : i32
    %c0_i32_0 = arith.constant 0 : i32
    %c0_i32_1 = arith.constant 0 : i32
    return %c0_i32, %c0_i32_0 : i32, i32
  }
  func.func @transform_3(%arg0: i32) -> (i32, i32) {
    %c0_i32 = arith.constant 0 : i32
    %c0_i32_0 = arith.constant 0 : i32
    return %arg0, %c0_i32 : i32, i32
  }
  func.func @transform_4(%arg0: i32) -> (i32, i32) {
    %c0_i32 = arith.constant 0 : i32
    %c0_i32_0 = arith.constant 0 : i32
    %c0_i32_1 = arith.constant 0 : i32
    return %c0_i32, %c0_i32_0 : i32, i32
  }
  func.func @transform_5(%arg0: i32) -> (i32, i32) {
    %c0_i32 = arith.constant 0 : i32
    %c0_i32_0 = arith.constant 0 : i32
    %c0_i32_1 = arith.constant 0 : i32
    return %c0_i32, %c0_i32_0 : i32, i32
  }
  func.func @transform_6(%arg0: i32) -> (i32, i32) {
    %c0_i32 = arith.constant 0 : i32
    %c0_i32_0 = arith.constant 0 : i32
    return %arg0, %c0_i32 : i32, i32
  }
}

module attributes {stable_mosaic.version = 11 : i64} {
  func.func @kernel(%arg0: i32, %arg1: memref<16x64xf32, #tpu.memory_space<vmem>>, %arg2: memref<64x32xbf16, #tpu.memory_space<vmem>>, %arg3: memref<1x32xf32, #tpu.memory_space<vmem>>, %arg4: memref<16x32xf32, #tpu.memory_space<vmem>>, %arg5: memref<1x32xf32, #tpu.memory_space<vmem>>, %arg6: memref<1x32xf32, #tpu.memory_space<vmem>>, %arg7: memref<16x32xf32, #tpu.memory_space<vmem>>) attributes {dimension_semantics = [#tpu.dimension_semantics<parallel>], iteration_bounds = array<i64: 2>, scalar_prefetch = 0 : i64, scratch_operands = 0 : i64, tpu.core_type = #tpu.core_type<tc>, window_params = [{transform_indices = @transform_0, window_bounds = array<i64: 16, 64>}, {pipeline_mode = #tpu.pipeline_mode<synchronous>, transform_indices = @transform_1, window_bounds = array<i64: 64, 32>}, {pipeline_mode = #tpu.pipeline_mode<synchronous>, transform_indices = @transform_2, window_bounds = array<i64: 1, 32>}, {transform_indices = @transform_3, window_bounds = array<i64: 16, 32>}, {pipeline_mode = #tpu.pipeline_mode<synchronous>, transform_indices = @transform_4, window_bounds = array<i64: 1, 32>}, {pipeline_mode = #tpu.pipeline_mode<synchronous>, transform_indices = @transform_5, window_bounds = array<i64: 1, 32>}, {transform_indices = @transform_6, window_bounds = array<i64: 16, 32>}]} {
    %c0 = arith.constant 0 : index
    %c0_0 = arith.constant 0 : index
    %0 = vector.load %arg2[%c0, %c0_0] : memref<64x32xbf16, #tpu.memory_space<vmem>>, vector<64x32xbf16>
    %c0_1 = arith.constant 0 : index
    %c0_2 = arith.constant 0 : index
    %1 = vector.load %arg3[%c0_1, %c0_2] : memref<1x32xf32, #tpu.memory_space<vmem>>, vector<1x32xf32>
    %c0_3 = arith.constant 0 : index
    %c0_4 = arith.constant 0 : index
    %2 = vector.load %arg5[%c0_3, %c0_4] : memref<1x32xf32, #tpu.memory_space<vmem>>, vector<1x32xf32>
    %c0_5 = arith.constant 0 : index
    %c0_6 = arith.constant 0 : index
    %3 = vector.load %arg6[%c0_5, %c0_6] : memref<1x32xf32, #tpu.memory_space<vmem>>, vector<1x32xf32>
    %c0_7 = arith.constant 0 : index
    %c0_8 = arith.constant 0 : index
    %4 = vector.load %arg1[%c0_7, %c0_8] : memref<16x64xf32, #tpu.memory_space<vmem>>, vector<16x64xf32>
    %5 = arith.truncf %4 : vector<16x64xf32> to vector<16x64xbf16>
    %cst = arith.constant dense<0.000000e+00> : vector<16x32xf32>
    %6 = tpu.matmul %5, %0, %cst {dimension_numbers = #tpu.dot_dimension_numbers<[1], [0], [0], [1], [0, 0, 1, 1], [], []>} : vector<16x64xbf16>, vector<64x32xbf16>, vector<16x32xf32> -> vector<16x32xf32>
    %7 = vector.broadcast %1 : vector<1x32xf32> to vector<16x32xf32>
    %8 = arith.addf %6, %7 : vector<16x32xf32>
    %c0_9 = arith.constant 0 : index
    %c0_10 = arith.constant 0 : index
    %9 = vector.load %arg4[%c0_9, %c0_10] : memref<16x32xf32, #tpu.memory_space<vmem>>, vector<16x32xf32>
    %10 = arith.addf %8, %9 : vector<16x32xf32>
    %cst_11 = arith.constant dense<0.000000e+00> : vector<16xf32>
    %11 = vector.multi_reduction <add>, %10, %cst_11 [1] : vector<16x32xf32> to vector<16xf32>
    %12 = vector.shape_cast %11 : vector<16xf32> to vector<16x1xf32>
    %13 = arith.mulf %10, %10 : vector<16x32xf32>
    %cst_12 = arith.constant dense<0.000000e+00> : vector<16xf32>
    %14 = vector.multi_reduction <add>, %13, %cst_12 [1] : vector<16x32xf32> to vector<16xf32>
    %15 = vector.shape_cast %14 : vector<16xf32> to vector<16x1xf32>
    %cst_13 = arith.constant 3.125000e-02 : f32
    %16 = vector.broadcast %cst_13 : f32 to vector<16x1xf32>
    %17 = arith.mulf %12, %16 : vector<16x1xf32>
    %cst_14 = arith.constant 3.125000e-02 : f32
    %18 = vector.broadcast %cst_14 : f32 to vector<16x1xf32>
    %19 = arith.mulf %15, %18 : vector<16x1xf32>
    %20 = arith.mulf %17, %17 : vector<16x1xf32>
    %21 = arith.subf %19, %20 : vector<16x1xf32>
    %cst_15 = arith.constant 0.000000e+00 : f32
    %22 = vector.broadcast %cst_15 : f32 to vector<16x1xf32>
    %23 = arith.maximumf %21, %22 : vector<16x1xf32>
    %24 = vector.broadcast %17 : vector<16x1xf32> to vector<16x32xf32>
    %25 = arith.subf %10, %24 : vector<16x32xf32>
    %cst_16 = arith.constant 9.99999996E-13 : f32
    %26 = vector.broadcast %cst_16 : f32 to vector<16x1xf32>
    %27 = arith.addf %23, %26 : vector<16x1xf32>
    %28 = math.rsqrt %27 : vector<16x1xf32>
    %29 = vector.broadcast %28 : vector<16x1xf32> to vector<16x32xf32>
    %30 = arith.mulf %25, %29 : vector<16x32xf32>
    %31 = vector.broadcast %2 : vector<1x32xf32> to vector<16x32xf32>
    %32 = arith.mulf %30, %31 : vector<16x32xf32>
    %33 = vector.broadcast %3 : vector<1x32xf32> to vector<16x32xf32>
    %34 = arith.addf %32, %33 : vector<16x32xf32>
    %c0_17 = arith.constant 0 : index
    %c0_18 = arith.constant 0 : index
    %35 = vector.load %arg7[%c0_17, %c0_18] : memref<16x32xf32, #tpu.memory_space<vmem>>, vector<16x32xf32>
    tpu.vector_store %arg7[%c0_17, %c0_18], %34 {strides = array<i32>} : memref<16x32xf32, #tpu.memory_space<vmem>>, vector<16x32xf32>,
    return
  }
  func.func @transform_0(%arg0: i32) -> (i32, i32) {
    %c0_i32 = arith.constant 0 : i32
    %c0_i32_0 = arith.constant 0 : i32
    return %arg0, %c0_i32 : i32, i32
  }
  func.func @transform_1(%arg0: i32) -> (i32, i32) {
    %c0_i32 = arith.constant 0 : i32
    %c0_i32_0 = arith.constant 0 : i32
    %c0_i32_1 = arith.constant 0 : i32
    return %c0_i32, %c0_i32_0 : i32, i32
  }
  func.func @transform_2(%arg0: i32) -> (i32, i32) {
    %c0_i32 = arith.constant 0 : i32
    %c0_i32_0 = arith.constant 0 : i32
    %c0_i32_1 = arith.constant 0 : i32
    return %c0_i32, %c0_i32_0 : i32, i32
  }
  func.func @transform_3(%arg0: i32) -> (i32, i32) {
    %c0_i32 = arith.constant 0 : i32
    %c0_i32_0 = arith.constant 0 : i32
    return %arg0, %c0_i32 : i32, i32
  }
  func.func @transform_4(%arg0: i32) -> (i32, i32) {
    %c0_i32 = arith.constant 0 : i32
    %c0_i32_0 = arith.constant 0 : i32
    %c0_i32_1 = arith.constant 0 : i32
    return %c0_i32, %c0_i32_0 : i32, i32
  }
  func.func @transform_5(%arg0: i32) -> (i32, i32) {
    %c0_i32 = arith.constant 0 : i32
    %c0_i32_0 = arith.constant 0 : i32
    %c0_i32_1 = arith.constant 0 : i32
    return %c0_i32, %c0_i32_0 : i32, i32
  }
  func.func @transform_6(%arg0: i32) -> (i32, i32) {
    %c0_i32 = arith.constant 0 : i32
    %c0_i32_0 = arith.constant 0 : i32
    return %arg0, %c0_i32 : i32, i32
  }
}

</mosaic_0001>

<bundles_post_ra>
// kernel: tpu_custom_call.1
= control target key start
LH: loop header
LB: loop body
LE: loop exit
PB: predicated region body
PF: predicated region fallthrough
CT: control target
= control target key end

     0   :  { %11 = vsyncpa [#allocation3], 0  ;;  %s894_s0 = inlined_call_operand.vmem [shape: f32[24,64], index: 0, kind: input, shape index: {}]   ;;  %s895_s1 = inlined_call_operand.vmem [shape: bf16[64,32], index: 1, kind: input, shape index: {}]   ;;  %s896_s2 = inlined_call_operand.vmem [shape: f32[1,32], index: 2, kind: input, shape index: {}]   ;;  %s897_s3 = inlined_call_operand.vmem [shape: f32[24,32], index: 3, kind: input, shape index: {}]   ;;  %s898_s4 = inlined_call_operand.vmem [shape: f32[1,32], index: 4, kind: input, shape index: {}]   ;;  %s899_s5 = inlined_call_operand.vmem [shape: f32[1,32], index: 5, kind: input, shape index: {}]   ;;  %s900_s6 = inlined_call_operand.hbm [shape: f32[24,32], index: 6, kind: output, shape index: {}]  }
   0x1   :  { %13 = vsyncpa [#allocation3 + $0x1], 0  ;;  %s743_s21 = smov 0   ;;  %s745_s22 = smov 0  }
   0x2   :  { %s747_s23 = smov 0   ;;  %s749_s24 = smov 0  }
   0x3 LB: > { %s764_s25 = sadd.s32 4294967295, %s703_s24   ;;  %s543_s26 = sadd.s32 4294967294, %s703_s24   ;;  %s703_s24 = sphi %s749_s24, %s907_s24   ;;  %s699_s23 = sphi %s747_s23, %s906_s23   ;;  %s695_s22 = sphi %s745_s22, %s905_s22   ;;  %s691_s21 = sphi %s743_s21, %s904_s21  }
   0x4   : > { %s768_s27 = sadd.s32 1, %s703_s24   ;;  %s162_s28 = sadd.s32 1, %s699_s23 }
   0x5   : > { %s159_s29 = ssub.s32 %s703_s24, %s768_s27  ;;  %p172_p0 = scmp.ne.s32.totalorder %s699_s23, %s695_s22 }
   0x6   : > { %p160_p1 = scmp.eq.s32.totalorder %s159_s29, 0  ;;  %p173_p2 = scmp.eq.s32.totalorder %s764_s25, 1 }
   0x7   : > { %p178_p3 = scmp.ne.s32.totalorder %s695_s22, %s691_s21  ;;  %p179_p4 = scmp.eq.s32.totalorder %s543_s26, 1 }
   0x8   : > { %s779_s30 = scalar_select %p160_p1, %s699_s23, %s162_s28  }
   0x9   : > { %p781_p5 = por %p173_p2, %p172_p0  ;;  %p785_p6 = por %p179_p4, %p178_p3 }
   0xa   : > { %p546_p7 = scmp.ge.s32.totalorder %s703_s24, 1  ;;  %p243_p8 = scmp.lt.s32.totalorder %s703_s24, 3 }
   0xc   : > { %p244_p9 = pnand %p546_p7, %p243_p8 }
   0xd   : > { %s795_s11 = sshll.u32 (!%p244_p9), %s764_s25, 1 }
   0xe   : > { %247 = sbr.rel (%p244_p9) target bundleno = 356 (0x164), region = 44  ;;  %p291_p10 = scmp.lt.s32.totalorder (!%p244_p9), %s795_s11, 2 }
  0x13   : > { %v581_v0 = vld [vmem:[%s895_s1 + $0x18] sm:$0xff]  ;;  %v580_v1 = vld [vmem:[%s895_s1 + $0x10] sm:$0xff]  ;;  %s292_s14 = scalar_select %p291_p10, %s795_s11, 2  ;;  %v579_v2 = vld [vmem:[%s895_s1 + $0x8] sm:$0xff]  ;;  %vm361_vm0 = vcmask 523264   ;;  %vm383_vm1 = vcmask 261120  }
  0x14   : > { %369 = vmatpush.bf16.msra.mxu0 %v581_v0  ;;  %v578_v3 = vld [vmem:[%s895_s1] sm:$0xff]  ;;  %s455_s28 = ssub.s32 (%p781_p5), 3, %s795_s11 }
  0x15   : > { %s549_s15 = sshll.u32 %s292_s14, 3  ;;  %v623_v7 = vld [vmem:[%s896_s2] ss:$0 sm:$0xff]  ;;  %s283_s14 = sand.u32 1, %s695_s22  }
  0x16   : > { %s294_s20 = scalar_lea.vmem %s894_s0, %s549_s15  ;;  %s308_s10 = scalar_lea.vmem %s897_s3, %s549_s15  ;;  %v624_v46 = vld [vmem:[%s898_s4] ss:$0 sm:$0xff] }
  0x17   : > { %v331_v4 = vld [vmem:[%s294_s20] sm:$0xff]  ;;  %v332_v5 = vld [vmem:[%s294_s20 + $0x8] sm:$0xff]  ;;  %s547_s19 = sshll.u32 %s283_s14, 4  ;;  %s834_s26 = scalar_lea.sflag [#allocation3], %s283_s14 }
  0x18   : > { %370 = vmatpush.bf16.msra.mxu0 %v580_v1  ;;  %v333_v6 = vpack.c.bf16 %v332_v5, %v331_v4  ;;  %v379_v9 = vld [vmem:[%s308_s10] sm:$0xff]  ;;  %v380_v16 = vld [vmem:[%s308_s10 + $0x8] sm:$0xff]  ;;  %s285_s20 = scalar_lea.vmem [#allocation2], %s547_s19  ;;  %p456_p11 = scmp.lt.s32.totalorder (%p781_p5), %s455_s28, 2 }
  0x19   : > { %v625_v49 = vld [vmem:[%s899_s5] ss:$0 sm:$0xff] }
  0x1c   : > { %371 = vmatpush.bf16.msra.mxu0 %v579_v2 }
  0x20   : > { %372 = vmatpush.bf16.msra.mxu0 %v578_v3 }
  0x23   : > { %568 = vmatmul.msk.bf16.vlgmr.msra.gmra.mxu0 %vm361_vm0, %v333_v6 }
  0xa0   : > { %v374_v8 = vpop.f32.mrf.mxu0 }
  0xa1   : > { %v375_v10 = vadd.f32 %v623_v7, %v374_v8 }
  0xa3   : > { %v381_v11 = vadd.f32 %v379_v9, %v375_v10 }
  0xa5   : > { %v384_v12 = vsel %vm383_vm1, %v381_v11, 0.0  ;;  %v390_v13 = vmul.f32 %v381_v11, %v381_v11 }
  0xa6   : > { %385 = vadd.xlane.f32.xlu0 %v384_v12 }
  0xa7   : > { %v392_v14 = vsel %vm383_vm1, %v390_v13, 0.0 }
  0xa8   : > { %v376_v15 = vpop.f32.mrf.mxu0  ;;  %393 = vadd.xlane.f32.xlu1 %v392_v14 }
  0xa9   : > { %v377_v17 = vadd.f32 %v623_v7, %v376_v15 }
  0xab   : > { %v382_v18 = vadd.f32 %v380_v16, %v377_v17 }
  0xad   : > { %v387_v19 = vsel %vm383_vm1, %v382_v18, 0.0  ;;  %v391_v20 = vmul.f32 %v382_v18, %v382_v18 }
  0xae   : > { %388 = vadd.xlane.f32.xlu0 %v387_v19 }
  0xaf   : > { %v395_v21 = vsel %vm383_vm1, %v391_v20, 0.0 }
  0xb0   : > { %396 = vadd.xlane.f32.xlu1 %v395_v21 }
 0x119   : > { %v386_v22 = vpop.xlane.xlu0 %385 }
 0x11a   : > { %v398_v23 = vmul.f32 0.03125, %v386_v22 }
 0x11b   : > { %v394_v24 = vpop.xlane.xlu1 %393 }
 0x11c   : > { %v402_v25 = vmul.f32 %v398_v23, %v398_v23  ;;  %v400_v26 = vmul.f32 0.03125, %v394_v24  ;;  %v408_v45 = vsub.f32 %v381_v11, %v398_v23 }
 0x11e   : > { %v404_v27 = vsub.f32 %v400_v26, %v402_v25 }
 0x120   : > { %v406_v28 = vmax.f32 %v404_v27, 0.0 }
 0x121   : > { %v389_v29 = vpop.xlane.xlu0 %388 }
 0x122   : > { %v410_v30 = vadd.f32 1e-12, %v406_v28  ;;  %v399_v31 = vmul.f32 0.03125, %v389_v29 }
 0x123   : > { %v397_v32 = vpop.xlane.xlu1 %396 }
 0x124   : > { %626 = vrsqrt.f32 %v410_v30  ;;  %v403_v33 = vmul.f32 %v399_v31, %v399_v31  ;;  %v401_v34 = vmul.f32 0.03125, %v397_v32  ;;  %vm418_vm3 = vweird.f32 %v410_v30 }
 0x125   : > { %v409_v57 = vsub.f32 %v382_v18, %v399_v31 }
 0x126   : > { %v405_v35 = vsub.f32 %v401_v34, %v403_v33 }
 0x128   : > { %v407_v36 = vmax.f32 %v405_v35, 0.0 }
 0x12a   : > { %v627_v37 = vpop.eup %626  ;;  %v411_v39 = vadd.f32 1e-12, %v407_v36 }
 0x12b   : > { %v413_v38 = vmul.f32 %v627_v37, %v410_v30  ;;  %vm419_vm2 = vweird.f32 %v627_v37 }
 0x12c   : > { %628 = vrsqrt.f32 %v411_v39  ;;  %vm420_vm4 = vmor %vm418_vm3, %vm419_vm2  ;;  %vm428_vm6 = vweird.f32 %v411_v39 }
 0x12d   : > { %v414_v40 = vmul.f32 %v627_v37, %v413_v38 }
 0x12f   : > { %v415_v41 = vmul.f32 0.5, %v414_v40 }
 0x131   : > { %v416_v42 = vsub.f32 1.5, %v415_v41 }
 0x132   : > { %v629_v43 = vpop.eup %628 }
 0x133   : > { %v417_v44 = vmul.f32 %v627_v37, %v416_v42  ;;  %v423_v47 = vmul.f32 %v629_v43, %v411_v39  ;;  %vm429_vm5 = vweird.f32 %v629_v43 }
 0x134   : > { %vm430_vm7 = vmor %vm428_vm6, %vm429_vm5 }
 0x135   : > { %v421_v48 = vsel %vm420_vm4, %v627_v37, %v417_v44  ;;  %v424_v51 = vmul.f32 %v629_v43, %v423_v47 }
 0x136   : > { %v432_v50 = vmul.f32 %v421_v48, %v408_v45 }
 0x137   : > { %v425_v53 = vmul.f32 0.5, %v424_v51 }
 0x138   : > { %v437_v52 = vmul.f32 %v624_v46, %v432_v50 }
 0x139   : > { %v426_v55 = vsub.f32 1.5, %v425_v53 }
 0x13a   : > { %v442_v54 = vadd.f32 %v625_v49, %v437_v52 }
 0x13b   : > { %v427_v56 = vmul.f32 %v629_v43, %v426_v55 }
 0x13c   : > { %444 = vst.msk [vmem:[%s285_s20] sm:$0xff] %vm383_vm1, %v442_v54 }
 0x13d   : > { %v431_v58 = vsel %vm430_vm7, %v629_v43, %v427_v56 }
 0x13e   : > { %v433_v59 = vmul.f32 %v431_v58, %v409_v57 }
 0x140   : > { %v438_v60 = vmul.f32 %v624_v46, %v433_v59  ;;  %453 = sbr.rel (!%p781_p5) target bundleno = 356 (0x164), region = 48 }
 0x142   : > { %v443_v61 = vadd.f32 %v625_v49, %v438_v60 }
 0x144   : > { %445 = vst.msk [vmem:[%s285_s20 + $0x8] sm:$0xff] %vm383_vm1, %v443_v61 }
 0x145   : > { %s909_s28 = smov (!%p456_p11, %s455_s28), 2 }
 0x146   : > { %s571_s29 = sshll.u32 %s909_s28, 3 }
 0x147   : > { %s459_s9 = ssub.s32 16, %s571_s29 }
 0x148   : > { %s460_s10 = sshll.u32 %s459_s9, 4 }
 0x149   : > { %461 = vsyncadd %s834_s26, %s460_s10  ;;  %p843_p12 = scmp.ne.s32.totalorder %s571_s29, 0  ;;  %s582_s7 = sshll.u32 %s764_s25, 4 }
 0x14a   : > { %s464_s11 = scalar_lea.hbm %s900_s6, %s582_s7  ;;  %s466_s15 = sshll.u32 %s285_s20, 4  ;;  %s851_s15 = int_to_ptr.vmem [resolvable:$true] %s466_s15 }
 0x14b   : > { %s468_s16 = sshll.u32 %s464_s11, 4  ;;  %s575_s17 = sshll.u32 %s909_s28, 7  ;;  %s853_s16 = int_to_ptr.hbm [resolvable:$true] %s468_s16 }
 0x14c   : > { %s630_s18 = sshra.s32 %s851_s15, 4  ;;  %s632_s19 = sshrl.u32 %s575_s17, 4  ;;  %s631_s18 = int_to_ptr.vmem [resolvable:$true] %s630_s18 }
 0x14d   : > { %s637_s29 = scalar_lea.vmem %s631_s18, %s632_s19  ;;  %s705_s25 = smov [#allocation2]  }
 0x14e   : > { %p638_p13 = scmp.ne.s32.totalorder %s631_s18, %s637_s29  ;;  %s641_s9 = scalar_lea.vmem %s705_s25, 32 }
 0x14f   : > { %p643_p2 = scmp.lt.s32.totalorder %s641_s9, %s637_s29 }
 0x150   : > { %p639_p0 = pnand %p638_p13, %p843_p12 }
 0x152   : > { %p640_p1 = pneg %p639_p0 }
 0x154   : > { %p645_p3 = pnand %p643_p2, %p640_p1 }
 0x156   : > { %648 = shalt.err (!%p645_p3)
}
 0x157   : > { %s649_s20 = sshra.s32 %s853_s16, 4  ;;  %s660_s14 = scalar_lea.hbm %s900_s6, 24  ;;  %s650_s20 = int_to_ptr.hbm [resolvable:$true] %s649_s20 }
 0x158   : > { %s656_s10 = scalar_lea.hbm %s650_s20, %s632_s19  ;;  %p661_p8 = scmp.lt.s32.totalorder %s650_s20, %s900_s6 }
 0x159   : > { %p657_p4 = scmp.ne.s32.totalorder %s650_s20, %s656_s10  ;;  %p662_p9 = scmp.lt.s32.totalorder %s660_s14, %s656_s10 }
 0x15b   : > { %p658_p5 = pnand %p657_p4, %p843_p12  ;;  %p663_p10 = por %p662_p9, %p661_p8 }
 0x15d   : > { %p659_p7 = pneg %p658_p5 }
 0x15f   : > { %p664_p11 = pnand %p663_p10, %p659_p7 }
 0x161   : > { %667 = shalt.err (!%p664_p11)
}
 0x162   : > { %s706_s29 = smov 128   ;;  %s707_s19 = smov 8  }
 0x163   : > { %474 = dma.vmem_to_hbm [thread:$0]  (%p843_p12), %s851_s15, %s575_s17, %s853_s16, %s834_s26, %s706_s29, %s706_s29, %s707_s19  }
 0x164 PF: > { %p588_p13 = scmp.ge.s32.totalorder %s703_s24, 2  ;;  %s483_s25 = sand.u32 1, %s691_s21  }
 0x165   : > { %s484_s9 = scalar_lea.sflag [#allocation3], %s483_s25 }
 0x166   : > { %p585_p0 = pnand %p588_p13, %p785_p6 }
 0x168   : > { %p586_p1 = pneg %p585_p0 }
 0x16a   : > { %686 = dma.done.wait (%p586_p1), %s484_s9, 256  }
 0x16b   : > { %688 = vsyncadd (%p586_p1), %s484_s9, 4294967040  ;;  %p16_p2 = scmp.ge.s32.totalorder %s768_s27, 4   ;;  %s904_s21 = smov %s695_s22 }
 0x16c   : > { %s905_s22 = smov %s699_s23  ;;  %s906_s23 = smov %s779_s30 }
 0x16d   : > { %s907_s24 = smov %s768_s27  ;;  %18 = sbr.rel (!%p16_p2) target bundleno = 3 (0x3), region = 82 }
 0x172   :  { %490 = vsyncpa [#allocation3], 1 }
 0x173   :  { %492 = vsyncpa [#allocation3 + $0x1], 1 }

// kernel: tpu_custom_call.1
= control target key start
LH: loop header
LB: loop body
LE: loop exit
PB: predicated region body
PF: predicated region fallthrough
CT: control target
= control target key end

     0   :  { %11 = vsyncpa [#allocation3], 0  ;;  %s894_s0 = inlined_call_operand.vmem [shape: f32[24,64], index: 0, kind: input, shape index: {}]   ;;  %s895_s1 = inlined_call_operand.vmem [shape: bf16[64,32], index: 1, kind: input, shape index: {}]   ;;  %s896_s2 = inlined_call_operand.vmem [shape: f32[1,32], index: 2, kind: input, shape index: {}]   ;;  %s897_s3 = inlined_call_operand.vmem [shape: f32[24,32], index: 3, kind: input, shape index: {}]   ;;  %s898_s4 = inlined_call_operand.vmem [shape: f32[1,32], index: 4, kind: input, shape index: {}]   ;;  %s899_s5 = inlined_call_operand.vmem [shape: f32[1,32], index: 5, kind: input, shape index: {}]   ;;  %s900_s6 = inlined_call_operand.hbm [shape: f32[24,32], index: 6, kind: output, shape index: {}]  }
   0x1   :  { %13 = vsyncpa [#allocation3 + $0x1], 0  ;;  %s743_s21 = smov 0   ;;  %s745_s22 = smov 0  }
   0x2   :  { %s747_s23 = smov 0   ;;  %s749_s24 = smov 0  }
   0x3 LB: > { %s764_s25 = sadd.s32 4294967295, %s703_s24   ;;  %s543_s26 = sadd.s32 4294967294, %s703_s24   ;;  %s703_s24 = sphi %s749_s24, %s907_s24   ;;  %s699_s23 = sphi %s747_s23, %s906_s23   ;;  %s695_s22 = sphi %s745_s22, %s905_s22   ;;  %s691_s21 = sphi %s743_s21, %s904_s21  }
   0x4   : > { %s768_s27 = sadd.s32 1, %s703_s24   ;;  %s162_s28 = sadd.s32 1, %s699_s23 }
   0x5   : > { %s159_s29 = ssub.s32 %s703_s24, %s768_s27  ;;  %p172_p0 = scmp.ne.s32.totalorder %s699_s23, %s695_s22 }
   0x6   : > { %p160_p1 = scmp.eq.s32.totalorder %s159_s29, 0  ;;  %p173_p2 = scmp.eq.s32.totalorder %s764_s25, 1 }
   0x7   : > { %p178_p3 = scmp.ne.s32.totalorder %s695_s22, %s691_s21  ;;  %p179_p4 = scmp.eq.s32.totalorder %s543_s26, 1 }
   0x8   : > { %s779_s30 = scalar_select %p160_p1, %s699_s23, %s162_s28  }
   0x9   : > { %p781_p5 = por %p173_p2, %p172_p0  ;;  %p785_p6 = por %p179_p4, %p178_p3 }
   0xa   : > { %p546_p7 = scmp.ge.s32.totalorder %s703_s24, 1  ;;  %p243_p8 = scmp.lt.s32.totalorder %s703_s24, 3 }
   0xc   : > { %p244_p9 = pnand %p546_p7, %p243_p8 }
   0xd   : > { %s795_s11 = sshll.u32 (!%p244_p9), %s764_s25, 1 }
   0xe   : > { %247 = sbr.rel (%p244_p9) target bundleno = 356 (0x164), region = 44  ;;  %p291_p10 = scmp.lt.s32.totalorder (!%p244_p9), %s795_s11, 2 }
  0x13   : > { %v581_v0 = vld [vmem:[%s895_s1 + $0x18] sm:$0xff]  ;;  %v580_v1 = vld [vmem:[%s895_s1 + $0x10] sm:$0xff]  ;;  %s292_s14 = scalar_select %p291_p10, %s795_s11, 2  ;;  %v579_v2 = vld [vmem:[%s895_s1 + $0x8] sm:$0xff]  ;;  %vm361_vm0 = vcmask 523264   ;;  %vm383_vm1 = vcmask 261120  }
  0x14   : > { %369 = vmatpush.bf16.msra.mxu0 %v581_v0  ;;  %v578_v3 = vld [vmem:[%s895_s1] sm:$0xff]  ;;  %s455_s28 = ssub.s32 (%p781_p5), 3, %s795_s11 }
  0x15   : > { %s549_s15 = sshll.u32 %s292_s14, 3  ;;  %v623_v7 = vld [vmem:[%s896_s2] ss:$0 sm:$0xff]  ;;  %s283_s14 = sand.u32 1, %s695_s22  }
  0x16   : > { %s294_s20 = scalar_lea.vmem %s894_s0, %s549_s15  ;;  %s308_s10 = scalar_lea.vmem %s897_s3, %s549_s15  ;;  %v624_v46 = vld [vmem:[%s898_s4] ss:$0 sm:$0xff] }
  0x17   : > { %v331_v4 = vld [vmem:[%s294_s20] sm:$0xff]  ;;  %v332_v5 = vld [vmem:[%s294_s20 + $0x8] sm:$0xff]  ;;  %s547_s19 = sshll.u32 %s283_s14, 4  ;;  %s834_s26 = scalar_lea.sflag [#allocation3], %s283_s14 }
  0x18   : > { %370 = vmatpush.bf16.msra.mxu0 %v580_v1  ;;  %v333_v6 = vpack.c.bf16 %v332_v5, %v331_v4  ;;  %v379_v9 = vld [vmem:[%s308_s10] sm:$0xff]  ;;  %v380_v16 = vld [vmem:[%s308_s10 + $0x8] sm:$0xff]  ;;  %s285_s20 = scalar_lea.vmem [#allocation2], %s547_s19  ;;  %p456_p11 = scmp.lt.s32.totalorder (%p781_p5), %s455_s28, 2 }
  0x19   : > { %v625_v49 = vld [vmem:[%s899_s5] ss:$0 sm:$0xff] }
  0x1c   : > { %371 = vmatpush.bf16.msra.mxu0 %v579_v2 }
  0x20   : > { %372 = vmatpush.bf16.msra.mxu0 %v578_v3 }
  0x23   : > { %568 = vmatmul.msk.bf16.vlgmr.msra.gmra.mxu0 %vm361_vm0, %v333_v6 }
  0xa0   : > { %v374_v8 = vpop.f32.mrf.mxu0 }
  0xa1   : > { %v375_v10 = vadd.f32 %v623_v7, %v374_v8 }
  0xa3   : > { %v381_v11 = vadd.f32 %v379_v9, %v375_v10 }
  0xa5   : > { %v384_v12 = vsel %vm383_vm1, %v381_v11, 0.0  ;;  %v390_v13 = vmul.f32 %v381_v11, %v381_v11 }
  0xa6   : > { %385 = vadd.xlane.f32.xlu0 %v384_v12 }
  0xa7   : > { %v392_v14 = vsel %vm383_vm1, %v390_v13, 0.0 }
  0xa8   : > { %v376_v15 = vpop.f32.mrf.mxu0  ;;  %393 = vadd.xlane.f32.xlu1 %v392_v14 }
  0xa9   : > { %v377_v17 = vadd.f32 %v623_v7, %v376_v15 }
  0xab   : > { %v382_v18 = vadd.f32 %v380_v16, %v377_v17 }
  0xad   : > { %v387_v19 = vsel %vm383_vm1, %v382_v18, 0.0  ;;  %v391_v20 = vmul.f32 %v382_v18, %v382_v18 }
  0xae   : > { %388 = vadd.xlane.f32.xlu0 %v387_v19 }
  0xaf   : > { %v395_v21 = vsel %vm383_vm1, %v391_v20, 0.0 }
  0xb0   : > { %396 = vadd.xlane.f32.xlu1 %v395_v21 }
 0x119   : > { %v386_v22 = vpop.xlane.xlu0 %385 }
 0x11a   : > { %v398_v23 = vmul.f32 0.03125, %v386_v22 }
 0x11b   : > { %v394_v24 = vpop.xlane.xlu1 %393 }
 0x11c   : > { %v402_v25 = vmul.f32 %v398_v23, %v398_v23  ;;  %v400_v26 = vmul.f32 0.03125, %v394_v24  ;;  %v408_v45 = vsub.f32 %v381_v11, %v398_v23 }
 0x11e   : > { %v404_v27 = vsub.f32 %v400_v26, %v402_v25 }
 0x120   : > { %v406_v28 = vmax.f32 %v404_v27, 0.0 }
 0x121   : > { %v389_v29 = vpop.xlane.xlu0 %388 }
 0x122   : > { %v410_v30 = vadd.f32 1e-12, %v406_v28  ;;  %v399_v31 = vmul.f32 0.03125, %v389_v29 }
 0x123   : > { %v397_v32 = vpop.xlane.xlu1 %396 }
 0x124   : > { %626 = vrsqrt.f32 %v410_v30  ;;  %v403_v33 = vmul.f32 %v399_v31, %v399_v31  ;;  %v401_v34 = vmul.f32 0.03125, %v397_v32  ;;  %vm418_vm3 = vweird.f32 %v410_v30 }
 0x125   : > { %v409_v57 = vsub.f32 %v382_v18, %v399_v31 }
 0x126   : > { %v405_v35 = vsub.f32 %v401_v34, %v403_v33 }
 0x128   : > { %v407_v36 = vmax.f32 %v405_v35, 0.0 }
 0x12a   : > { %v627_v37 = vpop.eup %626  ;;  %v411_v39 = vadd.f32 1e-12, %v407_v36 }
 0x12b   : > { %v413_v38 = vmul.f32 %v627_v37, %v410_v30  ;;  %vm419_vm2 = vweird.f32 %v627_v37 }
 0x12c   : > { %628 = vrsqrt.f32 %v411_v39  ;;  %vm420_vm4 = vmor %vm418_vm3, %vm419_vm2  ;;  %vm428_vm6 = vweird.f32 %v411_v39 }
 0x12d   : > { %v414_v40 = vmul.f32 %v627_v37, %v413_v38 }
 0x12f   : > { %v415_v41 = vmul.f32 0.5, %v414_v40 }
 0x131   : > { %v416_v42 = vsub.f32 1.5, %v415_v41 }
 0x132   : > { %v629_v43 = vpop.eup %628 }
 0x133   : > { %v417_v44 = vmul.f32 %v627_v37, %v416_v42  ;;  %v423_v47 = vmul.f32 %v629_v43, %v411_v39  ;;  %vm429_vm5 = vweird.f32 %v629_v43 }
 0x134   : > { %vm430_vm7 = vmor %vm428_vm6, %vm429_vm5 }
 0x135   : > { %v421_v48 = vsel %vm420_vm4, %v627_v37, %v417_v44  ;;  %v424_v51 = vmul.f32 %v629_v43, %v423_v47 }
 0x136   : > { %v432_v50 = vmul.f32 %v421_v48, %v408_v45 }
 0x137   : > { %v425_v53 = vmul.f32 0.5, %v424_v51 }
 0x138   : > { %v437_v52 = vmul.f32 %v624_v46, %v432_v50 }
 0x139   : > { %v426_v55 = vsub.f32 1.5, %v425_v53 }
 0x13a   : > { %v442_v54 = vadd.f32 %v625_v49, %v437_v52 }
 0x13b   : > { %v427_v56 = vmul.f32 %v629_v43, %v426_v55 }
 0x13c   : > { %444 = vst.msk [vmem:[%s285_s20] sm:$0xff] %vm383_vm1, %v442_v54 }
 0x13d   : > { %v431_v58 = vsel %vm430_vm7, %v629_v43, %v427_v56 }
 0x13e   : > { %v433_v59 = vmul.f32 %v431_v58, %v409_v57 }
 0x140   : > { %v438_v60 = vmul.f32 %v624_v46, %v433_v59  ;;  %453 = sbr.rel (!%p781_p5) target bundleno = 356 (0x164), region = 48 }
 0x142   : > { %v443_v61 = vadd.f32 %v625_v49, %v438_v60 }
 0x144   : > { %445 = vst.msk [vmem:[%s285_s20 + $0x8] sm:$0xff] %vm383_vm1, %v443_v61 }
 0x145   : > { %s909_s28 = smov (!%p456_p11, %s455_s28), 2 }
 0x146   : > { %s571_s29 = sshll.u32 %s909_s28, 3 }
 0x147   : > { %s459_s9 = ssub.s32 16, %s571_s29 }
 0x148   : > { %s460_s10 = sshll.u32 %s459_s9, 4 }
 0x149   : > { %461 = vsyncadd %s834_s26, %s460_s10  ;;  %p843_p12 = scmp.ne.s32.totalorder %s571_s29, 0  ;;  %s582_s7 = sshll.u32 %s764_s25, 4 }
 0x14a   : > { %s464_s11 = scalar_lea.hbm %s900_s6, %s582_s7  ;;  %s466_s15 = sshll.u32 %s285_s20, 4  ;;  %s851_s15 = int_to_ptr.vmem [resolvable:$true] %s466_s15 }
 0x14b   : > { %s468_s16 = sshll.u32 %s464_s11, 4  ;;  %s575_s17 = sshll.u32 %s909_s28, 7  ;;  %s853_s16 = int_to_ptr.hbm [resolvable:$true] %s468_s16 }
 0x14c   : > { %s630_s18 = sshra.s32 %s851_s15, 4  ;;  %s632_s19 = sshrl.u32 %s575_s17, 4  ;;  %s631_s18 = int_to_ptr.vmem [resolvable:$true] %s630_s18 }
 0x14d   : > { %s637_s29 = scalar_lea.vmem %s631_s18, %s632_s19  ;;  %s705_s25 = smov [#allocation2]  }
 0x14e   : > { %p638_p13 = scmp.ne.s32.totalorder %s631_s18, %s637_s29  ;;  %s641_s9 = scalar_lea.vmem %s705_s25, 32 }
 0x14f   : > { %p643_p2 = scmp.lt.s32.totalorder %s641_s9, %s637_s29 }
 0x150   : > { %p639_p0 = pnand %p638_p13, %p843_p12 }
 0x152   : > { %p640_p1 = pneg %p639_p0 }
 0x154   : > { %p645_p3 = pnand %p643_p2, %p640_p1 }
 0x156   : > { %648 = shalt.err (!%p645_p3)
}
 0x157   : > { %s649_s20 = sshra.s32 %s853_s16, 4  ;;  %s660_s14 = scalar_lea.hbm %s900_s6, 24  ;;  %s650_s20 = int_to_ptr.hbm [resolvable:$true] %s649_s20 }
 0x158   : > { %s656_s10 = scalar_lea.hbm %s650_s20, %s632_s19  ;;  %p661_p8 = scmp.lt.s32.totalorder %s650_s20, %s900_s6 }
 0x159   : > { %p657_p4 = scmp.ne.s32.totalorder %s650_s20, %s656_s10  ;;  %p662_p9 = scmp.lt.s32.totalorder %s660_s14, %s656_s10 }
 0x15b   : > { %p658_p5 = pnand %p657_p4, %p843_p12  ;;  %p663_p10 = por %p662_p9, %p661_p8 }
 0x15d   : > { %p659_p7 = pneg %p658_p5 }
 0x15f   : > { %p664_p11 = pnand %p663_p10, %p659_p7 }
 0x161   : > { %667 = shalt.err (!%p664_p11)
}
 0x162   : > { %s706_s29 = smov 128   ;;  %s707_s19 = smov 8  }
 0x163   : > { %474 = dma.vmem_to_hbm [thread:$0]  (%p843_p12), %s851_s15, %s575_s17, %s853_s16, %s834_s26, %s706_s29, %s706_s29, %s707_s19  }
 0x164 PF: > { %p588_p13 = scmp.ge.s32.totalorder %s703_s24, 2  ;;  %s483_s25 = sand.u32 1, %s691_s21  }
 0x165   : > { %s484_s9 = scalar_lea.sflag [#allocation3], %s483_s25 }
 0x166   : > { %p585_p0 = pnand %p588_p13, %p785_p6 }
 0x168   : > { %p586_p1 = pneg %p585_p0 }
 0x16a   : > { %686 = dma.done.wait (%p586_p1), %s484_s9, 256  }
 0x16b   : > { %688 = vsyncadd (%p586_p1), %s484_s9, 4294967040  ;;  %p16_p2 = scmp.ge.s32.totalorder %s768_s27, 4   ;;  %s904_s21 = smov %s695_s22 }
 0x16c   : > { %s905_s22 = smov %s699_s23  ;;  %s906_s23 = smov %s779_s30 }
 0x16d   : > { %s907_s24 = smov %s768_s27  ;;  %18 = sbr.rel (!%p16_p2) target bundleno = 3 (0x3), region = 82 }
 0x172   :  { %490 = vsyncpa [#allocation3], 1 }
 0x173   :  { %492 = vsyncpa [#allocation3 + $0x1], 1 }

</bundles_post_ra>
